<compile_context>
chip_gen: v5e
topology: v5e:2x2
jax: 0.10.0
libtpu: 0.0.40
codegen_flags: <defaults>
</compile_context>

<pallas_src>
import jax
import jax.numpy as jnp
from jax.experimental import pallas as pl
from jax.experimental.pallas import tpu as pltpu

_LANE = 128
_MAX_COL_TILE = 2048                 # feature-dim tile for very wide V (multiple of 128)
_MIN_MULTISTEP_BYTES = 2 * 1024 * 1024   # above this, force a multi-step grid
_XLA_DISPATCH_BYTES = 256 * 1024         # below this, skip pallas entirely


# --------------------------------------------------------------------------- kernel

def _normalizer_kernel(x_ref, scale_ref, bias_ref, o_ref):
    # x_ref: (tile_rows, tile_cols); scale_ref / bias_ref: (1, tile_cols) broadcast rows.
    x = x_ref[...].astype(jnp.float32)
    y = x * scale_ref[...] + bias_ref[...]
    o_ref[...] = jnp.clip(y, -5.0, 5.0).astype(o_ref.dtype)


# --------------------------------------------------------------------------- tiling helpers

def _vmem_budget():
    """(per-tile buffer budget, vmem_limit_bytes) tuned per TPU generation."""
    cap = 64 * 1024 * 1024  # conservative default (v7x per-TC physical VMEM)
    try:
        info = pltpu.get_tpu_info()
        cap_attr = getattr(info, "vmem_capacity_bytes", None)
        if cap_attr:
            cap = int(cap_attr)
    except Exception:
        pass
    if cap >= 100 * 1024 * 1024:          # v5e / v6e: 128 MiB VMEM -> bigger tiles
        return 8 * 1024 * 1024, 64 * 1024 * 1024
    return 4 * 1024 * 1024, 32 * 1024 * 1024


def _sublane_multiple(itemsize):
    # f32 -> 8, bf16/f16 -> 16, int8/fp8 -> 32 (sub-32-bit dtypes pack along sublanes).
    return max(8, 32 // max(1, itemsize))


def _pick_row_tile(rows, tile_cols, itemsize, budget):
    """Largest row tile that (a) fits the VMEM budget and (b) keeps a multi-step grid."""
    m = _sublane_multiple(itemsize)
    bytes_per_row = max(1, tile_cols * itemsize)
    max_rows = max(m, (budget // bytes_per_row) // m * m)
    if rows * bytes_per_row > _MIN_MULTISTEP_BYTES:
        # Never collapse a large input to a 1-step grid: keep >= ~8 steps so the
        # pipeline overlaps DMA/compute and the parallel axis shards across both
        # v7x TensorCores.
        target = -(-rows // 8)                       # cdiv(rows, 8)
        target = max(m, ((target + m - 1) // m) * m)
        max_rows = min(max_rows, target)
    if rows <= max_rows:
        return rows                                  # full dim is always a legal block
    return max(m, min(rows, max_rows))


# --------------------------------------------------------------------------- pallas driver

def _run_pallas(x2d, scale_row, bias_row, row_tile=None):
    rows, width = x2d.shape
    itemsize = x2d.dtype.itemsize
    budget, vmem_limit = _vmem_budget()

    # Optional column tiling for very wide feature dims (keeps tiles contiguous,
    # multiple-of-128 wide, and within the per-generation VMEM budget).
    if width % _LANE == 0 and width > _MAX_COL_TILE:
        col_tile = _MAX_COL_TILE
    else:
        col_tile = width

    tile = (_pick_row_tile(rows, col_tile, itemsize, budget)
            if row_tile is None else row_tile)

    cost = pl.CostEstimate(
        flops=4 * rows * width,                               # mul + add + 2x clamp
        transcendentals=0,
        bytes_accessed=2 * rows * width * itemsize + 2 * width * 4,
    )

    if col_tile == width:
        grid = (pl.cdiv(rows, tile),)
        in_specs = [
            pl.BlockSpec((tile, width), lambda i: (i, 0)),    # x tile (streamed)
            pl.BlockSpec((1, width), lambda i: (0, 0)),       # scale row (resident)
            pl.BlockSpec((1, width), lambda i: (0, 0)),       # bias row (resident)
        ]
        out_specs = pl.BlockSpec((tile, width), lambda i: (i, 0))
        dims = ("parallel",)
    else:
        grid = (pl.cdiv(rows, tile), pl.cdiv(width, col_tile))
        in_specs = [
            pl.BlockSpec((tile, col_tile), lambda i, j: (i, j)),
            pl.BlockSpec((1, col_tile), lambda i, j: (0, j)),
            pl.BlockSpec((1, col_tile), lambda i, j: (0, j)),
        ]
        out_specs = pl.BlockSpec((tile, col_tile), lambda i, j: (i, j))
        dims = ("parallel", "parallel")

    return pl.pallas_call(
        _normalizer_kernel,
        out_shape=jax.ShapeDtypeStruct((rows, width), x2d.dtype),
        grid=grid,
        in_specs=in_specs,
        out_specs=out_specs,
        compiler_params=pltpu.CompilerParams(
            # NOTE: on v7x, verify with xprof that the parallel axis shards across
            # both TensorCores; switch to pltpu.CORE_PARALLEL if it does not.
            dimension_semantics=dims,
            vmem_limit_bytes=vmem_limit,
        ),
        cost_estimate=cost,
    )(x2d, scale_row, bias_row)


# --------------------------------------------------------------------------- public forward

def normalizer_forward(x, running_mean, running_variance, normalization_steps,
                       *, force_pallas=False, row_tile=None):
    """x: [B, V]; running_mean / running_variance: [V]; normalization_steps: scalar."""
    B, V = x.shape
    steps = jnp.asarray(normalization_steps, jnp.float32)
    mean = running_mean.astype(jnp.float32)
    var = running_variance.astype(jnp.float32)

    # Grid-invariant per-feature affine, computed once in the wrapper (O(V) work).
    # Matches the reference (x - mean) / sqrt(var / steps) to ~1 ulp.
    scale = 1.0 / jnp.sqrt(var / steps)
    bias = -mean * scale

    total_bytes = B * V * x.dtype.itemsize
    if not force_pallas and total_bytes < _XLA_DISPATCH_BYTES:
        # Tiny RL-sized problems: custom-call launch overhead dominates; let XLA fuse.
        y = x.astype(jnp.float32) * scale + bias
        return jnp.clip(y, -5.0, 5.0).astype(x.dtype)

    if V % _LANE == 0:
        # Feature dim already lane-dense.
        return _run_pallas(x, scale.reshape(1, V), bias.reshape(1, V), row_tile)

    if V < _LANE and _LANE % V == 0:
        # Fold batch rows into lanes: [B, V] -> [B*V/128, 128] (contiguous reshape).
        # Pad B up to a multiple of the pack factor if needed (cheap), tile scale/bias
        # across the folded lanes so the kernel stays a pure row broadcast.
        pack = _LANE // V
        Bp = ((B + pack - 1) // pack) * pack
        xp = x if Bp == B else jnp.pad(x, ((0, Bp - B), (0, 0)))
        x2d = xp.reshape(Bp // pack, _LANE)
        scale_row = jnp.tile(scale, pack).reshape(1, _LANE)
        bias_row = jnp.tile(bias, pack).reshape(1, _LANE)
        out = _run_pallas(x2d, scale_row, bias_row, row_tile).reshape(Bp, V)
        return out[:B] if Bp != B else out

    # Ragged V (neither divides nor is divisible by 128): pad the feature dim to the
    # next multiple of 128 so the output stays lane-dense (unmasked vst), then slice.
    Vp = ((V + _LANE - 1) // _LANE) * _LANE
    xp = jnp.pad(x, ((0, 0), (0, Vp - V)))
    scale_p = jnp.pad(scale, (0, Vp - V)).reshape(1, Vp)
    bias_p = jnp.pad(bias, (0, Vp - V)).reshape(1, Vp)
    out = _run_pallas(xp, scale_p, bias_p, row_tile)
    return out[:, :V]


def reference_forward(x, running_mean, running_variance, normalization_steps):
    denom = jnp.sqrt(running_variance.astype(jnp.float32)
                     / jnp.asarray(normalization_steps, jnp.float32))
    return jnp.clip((x.astype(jnp.float32) - running_mean.astype(jnp.float32)) / denom,
                    -5.0, 5.0)


# TODO(synk): Normalizer.update() (stateful running-mean/variance buffer update) is not
# implemented here; only the forward normalization pass is.

if __name__ == "__main__":
    key = jax.random.PRNGKey(0)
    kx, km, kv, kx2, kx3, kx4 = jax.random.split(key, 6)

    # Buffers consistent with the module: vec_obs_size=32.
    vec_obs_size = 32
    normalization_steps = jnp.asarray(4, dtype=jnp.int32)
    running_mean = 0.1 * jax.random.normal(km, (vec_obs_size,), dtype=jnp.float32)
    running_variance = 1.0 + jnp.abs(jax.random.normal(kv, (vec_obs_size,), dtype=jnp.float32))

    # Case 1: small module-typical shape (batch=8, V=32) -> lane-folded path.
    x = jax.random.normal(kx, (8, vec_obs_size), dtype=jnp.float32) * 3.0
    out = jax.block_until_ready(
        normalizer_forward(x, running_mean, running_variance, normalization_steps,
                           force_pallas=True))
    ref = reference_forward(x, running_mean, running_variance, normalization_steps)
    assert out.shape == x.shape
    assert jnp.allclose(out, ref, atol=1e-5, rtol=1e-5), "mismatch (small folded case)"

    # Case 2: lane folding + multi-step grid (batch=256, V=32, rows=64, tile=16).
    x2 = jax.random.normal(kx2, (256, vec_obs_size), dtype=jnp.float32) * 3.0
    out2 = jax.block_until_ready(
        normalizer_forward(x2, running_mean, running_variance, normalization_steps,
                           force_pallas=True, row_tile=16))
    ref2 = reference_forward(x2, running_mean, running_variance, normalization_steps)
    assert jnp.allclose(out2, ref2, atol=1e-5, rtol=1e-5), "mismatch (tiled folded case)"

    # Case 3: batch padding for the fold (B=10 not a multiple of pack=4).
    x3 = jax.random.normal(kx3, (10, vec_obs_size), dtype=jnp.float32) * 3.0
    out3 = jax.block_until_ready(
        normalizer_forward(x3, running_mean, running_variance, normalization_steps,
                           force_pallas=True))
    ref3 = reference_forward(x3, running_mean, running_variance, normalization_steps)
    assert out3.shape == x3.shape
    assert jnp.allclose(out3, ref3, atol=1e-5, rtol=1e-5), "mismatch (padded-batch case)"

    # Case 4: ragged feature dim (V=48 -> padded to 128 lanes).
    V4 = 48
    mean4 = 0.1 * jax.random.normal(km, (V4,), dtype=jnp.float32)
    var4 = 1.0 + jnp.abs(jax.random.normal(kv, (V4,), dtype=jnp.float32))
    x4 = jax.random.normal(kx4, (16, V4), dtype=jnp.float32) * 3.0
    out4 = jax.block_until_ready(
        normalizer_forward(x4, mean4, var4, normalization_steps, force_pallas=True))
    ref4 = reference_forward(x4, mean4, var4, normalization_steps)
    assert out4.shape == x4.shape
    assert jnp.allclose(out4, ref4, atol=1e-5, rtol=1e-5), "mismatch (ragged-V case)"

    # Case 5: lane-dense V (V=128 -> direct path).
    x5 = jax.random.normal(kx, (64, 128), dtype=jnp.float32) * 3.0
    mean5 = 0.1 * jax.random.normal(km, (128,), dtype=jnp.float32)
    var5 = 1.0 + jnp.abs(jax.random.normal(kv, (128,), dtype=jnp.float32))
    out5 = jax.block_until_ready(
        normalizer_forward(x5, mean5, var5, normalization_steps, force_pallas=True))
    ref5 = reference_forward(x5, mean5, var5, normalization_steps)
    assert jnp.allclose(out5, ref5, atol=1e-5, rtol=1e-5), "mismatch (direct V=128 case)"

    # Case 6: bf16 input exercises dtype-aware sublane rounding / in-kernel cast.
    x6 = (jax.random.normal(kx2, (64, vec_obs_size), dtype=jnp.float32) * 3.0).astype(jnp.bfloat16)
    out6 = jax.block_until_ready(
        normalizer_forward(x6, running_mean, running_variance, normalization_steps,
                           force_pallas=True))
    ref6 = reference_forward(x6, running_mean, running_variance, normalization_steps)
    assert out6.dtype == jnp.bfloat16
    assert jnp.allclose(out6.astype(jnp.float32), ref6, atol=5e-2, rtol=5e-2), \
        "mismatch (bf16 case)"

    print("KERNEL_OK")
</pallas_src>

<mosaic_0001>
module attributes {stable_mosaic.version = 11 : i64} {
  func.func @_normalizer_kernel(%arg0: i32, %arg1: memref<2x128xf32, #tpu.memory_space<vmem>>, %arg2: memref<1x128xf32, #tpu.memory_space<vmem>>, %arg3: memref<1x128xf32, #tpu.memory_space<vmem>>, %arg4: memref<2x128xf32, #tpu.memory_space<vmem>>) attributes {dimension_semantics = [#tpu.dimension_semantics<parallel>], iteration_bounds = array<i64: 1>, scalar_prefetch = 0 : i64, scratch_operands = 0 : i64, tpu.core_type = #tpu.core_type<tc>, window_params = [{transform_indices = @transform_0, window_bounds = array<i64: 2, 128>}, {pipeline_mode = #tpu.pipeline_mode<synchronous>, transform_indices = @transform_1, window_bounds = array<i64: 1, 128>}, {pipeline_mode = #tpu.pipeline_mode<synchronous>, transform_indices = @transform_2, window_bounds = array<i64: 1, 128>}, {transform_indices = @transform_3, window_bounds = array<i64: 2, 128>}]} {
    %c0 = arith.constant 0 : index
    %c0_0 = arith.constant 0 : index
    %0 = vector.load %arg1[%c0, %c0_0] : memref<2x128xf32, #tpu.memory_space<vmem>>, vector<2x128xf32>
    %c0_1 = arith.constant 0 : index
    %c0_2 = arith.constant 0 : index
    %1 = vector.load %arg2[%c0_1, %c0_2] : memref<1x128xf32, #tpu.memory_space<vmem>>, vector<1x128xf32>
    %2 = vector.broadcast %1 : vector<1x128xf32> to vector<2x128xf32>
    %3 = arith.mulf %0, %2 : vector<2x128xf32>
    %c0_3 = arith.constant 0 : index
    %c0_4 = arith.constant 0 : index
    %4 = vector.load %arg3[%c0_3, %c0_4] : memref<1x128xf32, #tpu.memory_space<vmem>>, vector<1x128xf32>
    %5 = vector.broadcast %4 : vector<1x128xf32> to vector<2x128xf32>
    %6 = arith.addf %3, %5 : vector<2x128xf32>
    %cst = arith.constant -5.000000e+00 : f32
    %cst_5 = arith.constant 5.000000e+00 : f32
    %7 = vector.broadcast %cst : f32 to vector<2x128xf32>
    %8 = arith.maximumf %7, %6 : vector<2x128xf32>
    %9 = vector.broadcast %cst_5 : f32 to vector<2x128xf32>
    %10 = arith.minimumf %9, %8 : vector<2x128xf32>
    %c0_6 = arith.constant 0 : index
    %c0_7 = arith.constant 0 : index
    %11 = vector.load %arg4[%c0_6, %c0_7] : memref<2x128xf32, #tpu.memory_space<vmem>>, vector<2x128xf32>
    tpu.vector_store %arg4[%c0_6, %c0_7], %10 {strides = array<i32>} : memref<2x128xf32, #tpu.memory_space<vmem>>, vector<2x128xf32>,
    return
  }
  func.func @transform_0(%arg0: i32) -> (i32, i32) {
    %c0_i32 = arith.constant 0 : i32
    %c0_i32_0 = arith.constant 0 : i32
    return %arg0, %c0_i32 : i32, i32
  }
  func.func @transform_1(%arg0: i32) -> (i32, i32) {
    %c0_i32 = arith.constant 0 : i32
    %c0_i32_0 = arith.constant 0 : i32
    %c0_i32_1 = arith.constant 0 : i32
    return %c0_i32, %c0_i32_0 : i32, i32
  }
  func.func @transform_2(%arg0: i32) -> (i32, i32) {
    %c0_i32 = arith.constant 0 : i32
    %c0_i32_0 = arith.constant 0 : i32
    %c0_i32_1 = arith.constant 0 : i32
    return %c0_i32, %c0_i32_0 : i32, i32
  }
  func.func @transform_3(%arg0: i32) -> (i32, i32) {
    %c0_i32 = arith.constant 0 : i32
    %c0_i32_0 = arith.constant 0 : i32
    return %arg0, %c0_i32 : i32, i32
  }
}

</mosaic_0001>

<bundles_post_ra>
// kernel: tpu_custom_call.1
= control target key start
LH: loop header
LB: loop body
LE: loop exit
PB: predicated region body
PF: predicated region fallthrough
CT: control target
= control target key end

     0   :  { %8 = vsyncpa [#allocation3], 0  ;;  %s194_s0 = inlined_call_operand.hbm [shape: f32[2,128], index: 0, kind: input, shape index: {}]   ;;  %s195_s1 = inlined_call_operand.hbm [shape: f32[1,128], index: 1, kind: input, shape index: {}]   ;;  %s196_s2 = inlined_call_operand.vmem [shape: f32[1,128], index: 2, kind: input, shape index: {}]   ;;  %s197_s3 = inlined_call_operand.hbm [shape: f32[2,128], index: 3, kind: output, shape index: {}]  }
   0x1   :  { %9 = vsyncpa [#allocation6], 0 }
   0x2   :  { %10 = vsyncpa [#allocation4], 0  ;;  %s16_s14 = sshll.u32 %s194_s0, 4  ;;  %s159_s15 = smov [#allocation2]   ;;  %s17_s14 = int_to_ptr.hbm [resolvable:$true] %s16_s14 }
   0x3   :  { %s18_s16 = sshll.u32 %s159_s15, 4  ;;  %s27_s19 = sshll.u32 %s195_s1, 4  ;;  %s19_s16 = int_to_ptr.vmem [resolvable:$true] %s18_s16  ;;  %s28_s19 = int_to_ptr.hbm [resolvable:$true] %s27_s19 }
   0x4   :  { %21 = dma.hbm_to_vmem [thread:$0]  %s17_s14, 32, %s19_s16, [#allocation3]  }
   0x5   :  { %s160_s20 = smov [#allocation5]  }
   0x6   :  { %s29_s21 = sshll.u32 %s160_s20, 4  ;;  %s30_s21 = int_to_ptr.vmem [resolvable:$true] %s29_s21 }
   0x7   :  { %32 = dma.hbm_to_vmem [thread:$0]  %s28_s19, 16, %s30_s21, [#allocation6]  }
   0x8   :  { %153 = dma.done.wait [#allocation3], 32  }
   0x9   :  { %154 = vsyncadd [#allocation3], 4294967264 }
   0xa   :  { %155 = dma.done.wait [#allocation6], 16  }
   0xb   :  { %156 = vsyncadd [#allocation6], 4294967280  ;;  %v43_v0 = vld [vmem:[#allocation2] sm:$0x3]  ;;  %v79_v1 = vld [vmem:[#allocation5] ss:$0 sm:$0xff] }
   0xc   :  { %v80_v2 = vld [vmem:[%s196_s2] ss:$0 sm:$0xff]  ;;  %v48_v3 = vmul.f32 %v79_v1, %v43_v0  ;;  %s161_s23 = smov [#allocation7]   ;;  %s64_s26 = sshll.u32 %s197_s3, 4  ;;  %s65_s26 = int_to_ptr.hbm [resolvable:$true] %s64_s26 }
   0xd   :  { %s62_s24 = sshll.u32 %s161_s23, 4  ;;  %s63_s24 = int_to_ptr.vmem [resolvable:$true] %s62_s24 }
   0xe   :  { %v53_v4 = vadd.f32 %v80_v2, %v48_v3 }
  0x10   :  { %v75_v5 = vclamps-f32 %v53_v4, 5.0 }
  0x12   :  { %56 = vst [vmem:[#allocation7] sm:$0x3] %v75_v5 }
  0x13   :  { %67 = dma.vmem_to_hbm [thread:$0]  %s63_s24, 32, %s65_s26, [#allocation4]  }
  0x14   :  { %157 = dma.done.wait [#allocation4], 32  }
  0x15   :  { %158 = vsyncadd [#allocation4], 4294967264 }
  0x16   :  { %72 = vsyncpa [#allocation3], 1 }
  0x17   :  { %73 = vsyncpa [#allocation6], 1 }
  0x18   :  { %74 = vsyncpa [#allocation4], 1 }

</bundles_post_ra>
